<compile_context>
chip_gen: v7x
topology: tpu7x:2x2x1
jax: 0.10.0
libtpu: 0.0.40
codegen_flags: <defaults>
</compile_context>

<pallas_src>
import functools

import jax
import jax.numpy as jnp
from jax.experimental import pallas as pl
from jax.experimental.pallas import tpu as pltpu


def se_block_kernel(x_ref, w1_ref, b1_ref, w2w_ref, b2w_ref, w2b_ref, b2b_ref, o_ref):
    # x_ref: (tm, C) voxel rows. Weights are resident bf16 tiles, biases f32.
    x = x_ref[...]
    xf = x.astype(jnp.float32)
    x_bf = x.astype(jnp.bfloat16)

    # fc1: Conv1x1x1(C -> C/r) + ReLU  (bf16 operands, f32 accumulation on the MXU)
    h = jnp.dot(x_bf, w1_ref[...], preferred_element_type=jnp.float32)
    h = jnp.maximum(h + b1_ref[...], 0.0)
    h_bf = h.astype(jnp.bfloat16)

    # fc2: Conv1x1x1(C/r -> 2C), pre-split in the wrapper into gate / shift halves.
    w_logits = jnp.dot(h_bf, w2w_ref[...], preferred_element_type=jnp.float32)
    w_logits = w_logits + b2w_ref[...]
    b_shift = jnp.dot(h_bf, w2b_ref[...], preferred_element_type=jnp.float32)
    b_shift = b_shift + b2b_ref[...]

    gate = 1.0 / (1.0 + jnp.exp(-w_logits))           # sigmoid (exp goes to the EUP)
    o_ref[...] = (xf * gate + b_shift).astype(o_ref.dtype)


@functools.partial(jax.jit, static_argnames=("tm",))
def se_block(x, fc1_w, fc1_b, fc2_w, fc2_b, *, tm=256):
    """SEBlock forward (as written in the PyTorch module).

    x:      (B, C, D, H, W)  NCDHW
    fc1_w:  (C//r, C)   fc1_b: (C//r,)     -- first 1x1x1 conv
    fc2_w:  (2C, C//r)  fc2_b: (2C,)       -- second 1x1x1 conv
    Returns x * sigmoid(w) + b, same shape/dtype as x.
    """
    B, C, D, H, W = x.shape
    Cr = fc1_w.shape[0]
    M = B * D * H * W

    # Channels-last voxel rows: lane dim = C (ideally a multiple of 128).
    x2 = jnp.transpose(x, (0, 2, 3, 4, 1)).reshape(M, C)

    # Pre-transpose / pre-split / pre-cast the 1x1x1 conv weights for the MXU.
    w1 = fc1_w.T.astype(jnp.bfloat16)                  # (C, Cr)
    b1 = fc1_b.reshape(1, Cr).astype(jnp.float32)
    w2w = fc2_w[:C].T.astype(jnp.bfloat16)             # (Cr, C)  -> sigmoid gate half
    w2b = fc2_w[C:].T.astype(jnp.bfloat16)             # (Cr, C)  -> additive shift half
    b2w = fc2_b[:C].reshape(1, C).astype(jnp.float32)
    b2b = fc2_b[C:].reshape(1, C).astype(jnp.float32)

    tm = min(tm, M)
    assert M % tm == 0, "voxel count B*D*H*W must be divisible by the row tile"
    grid = (M // tm,)

    out2 = pl.pallas_call(
        se_block_kernel,
        out_shape=jax.ShapeDtypeStruct((M, C), x.dtype),
        grid_spec=pltpu.PrefetchScalarGridSpec(
            num_scalar_prefetch=0,
            grid=grid,
            in_specs=[
                pl.BlockSpec((tm, C), lambda i: (i, 0)),   # x voxel rows
                pl.BlockSpec((C, Cr), lambda i: (0, 0)),   # W1 (resident)
                pl.BlockSpec((1, Cr), lambda i: (0, 0)),   # b1
                pl.BlockSpec((Cr, C), lambda i: (0, 0)),   # W2 gate half (resident)
                pl.BlockSpec((1, C), lambda i: (0, 0)),    # b2 gate half
                pl.BlockSpec((Cr, C), lambda i: (0, 0)),   # W2 shift half (resident)
                pl.BlockSpec((1, C), lambda i: (0, 0)),    # b2 shift half
            ],
            out_specs=pl.BlockSpec((tm, C), lambda i: (i, 0)),
        ),
        compiler_params=pltpu.CompilerParams(
            # Row axis is embarrassingly parallel -> megacore sharding on v7x.
            dimension_semantics=("parallel",)),
    )(x2, w1, b1, w2w, b2w, w2b, b2b)

    return out2.reshape(B, D, H, W, C).transpose(0, 4, 1, 2, 3)


def reference(x, fc1_w, fc1_b, fc2_w, fc2_b):
    # Mirrors the kernel's bf16-operand / f32-accumulate matmuls so the check is tight.
    B, C, D, H, W = x.shape
    xr = jnp.transpose(x, (0, 2, 3, 4, 1)).reshape(-1, C)
    xf = xr.astype(jnp.float32)
    h = jnp.dot(xr.astype(jnp.bfloat16), fc1_w.T.astype(jnp.bfloat16),
                preferred_element_type=jnp.float32) + fc1_b
    h = jnp.maximum(h, 0.0)
    y = jnp.dot(h.astype(jnp.bfloat16), fc2_w.T.astype(jnp.bfloat16),
                preferred_element_type=jnp.float32) + fc2_b
    w_logits, b_shift = y[:, :C], y[:, C:]
    gate = 1.0 / (1.0 + jnp.exp(-w_logits))
    out = xf * gate + b_shift
    return out.reshape(B, D, H, W, C).transpose(0, 4, 1, 2, 3).astype(x.dtype)


if __name__ == "__main__":
    key = jax.random.PRNGKey(0)
    # Small but lane-dense: C is a multiple of 128; M = B*D*H*W = 1024 -> grid of 4 tiles.
    B, C, D, H, W = 2, 128, 8, 8, 8
    reduction = 4
    Cr = C // reduction

    k_x, k1, k2, k3, k4 = jax.random.split(key, 5)
    x = jax.random.normal(k_x, (B, C, D, H, W), dtype=jnp.float32)
    fc1_w = jax.random.normal(k1, (Cr, C), dtype=jnp.float32) / jnp.sqrt(C)
    fc1_b = 0.01 * jax.random.normal(k2, (Cr,), dtype=jnp.float32)
    fc2_w = jax.random.normal(k3, (2 * C, Cr), dtype=jnp.float32) / jnp.sqrt(Cr)
    fc2_b = 0.01 * jax.random.normal(k4, (2 * C,), dtype=jnp.float32)

    out = se_block(x, fc1_w, fc1_b, fc2_w, fc2_b, tm=256)
    out = jax.block_until_ready(out)

    ref = reference(x, fc1_w, fc1_b, fc2_w, fc2_b)
    assert out.shape == x.shape
    assert jnp.allclose(out, ref, atol=2e-3, rtol=2e-3), \
        float(jnp.max(jnp.abs(out - ref)))

    print("KERNEL_OK")
</pallas_src>

<mosaic_0001>
module attributes {stable_mosaic.version = 11 : i64} {
  func.func @se_block_kernel(%arg0: i32, %arg1: memref<256x128xf32, #tpu.memory_space<vmem>>, %arg2: memref<128x32xbf16, #tpu.memory_space<vmem>>, %arg3: memref<1x32xf32, #tpu.memory_space<vmem>>, %arg4: memref<32x128xbf16, #tpu.memory_space<vmem>>, %arg5: memref<1x128xf32, #tpu.memory_space<vmem>>, %arg6: memref<32x128xbf16, #tpu.memory_space<vmem>>, %arg7: memref<1x128xf32, #tpu.memory_space<vmem>>, %arg8: memref<256x128xf32, #tpu.memory_space<vmem>>) attributes {dimension_semantics = [#tpu.dimension_semantics<parallel>], iteration_bounds = array<i64: 4>, scalar_prefetch = 0 : i64, scratch_operands = 0 : i64, tpu.core_type = #tpu.core_type<tc>, window_params = [{transform_indices = @transform_0, window_bounds = array<i64: 256, 128>}, {pipeline_mode = #tpu.pipeline_mode<synchronous>, transform_indices = @transform_1, window_bounds = array<i64: 128, 32>}, {pipeline_mode = #tpu.pipeline_mode<synchronous>, transform_indices = @transform_2, window_bounds = array<i64: 1, 32>}, {pipeline_mode = #tpu.pipeline_mode<synchronous>, transform_indices = @transform_3, window_bounds = array<i64: 32, 128>}, {pipeline_mode = #tpu.pipeline_mode<synchronous>, transform_indices = @transform_4, window_bounds = array<i64: 1, 128>}, {pipeline_mode = #tpu.pipeline_mode<synchronous>, transform_indices = @transform_5, window_bounds = array<i64: 32, 128>}, {pipeline_mode = #tpu.pipeline_mode<synchronous>, transform_indices = @transform_6, window_bounds = array<i64: 1, 128>}, {transform_indices = @transform_7, window_bounds = array<i64: 256, 128>}]} {
    %c0 = arith.constant 0 : index
    %c0_0 = arith.constant 0 : index
    %0 = vector.load %arg1[%c0, %c0_0] : memref<256x128xf32, #tpu.memory_space<vmem>>, vector<256x128xf32>
    %1 = arith.truncf %0 : vector<256x128xf32> to vector<256x128xbf16>
    %c0_1 = arith.constant 0 : index
    %c0_2 = arith.constant 0 : index
    %2 = vector.load %arg2[%c0_1, %c0_2] : memref<128x32xbf16, #tpu.memory_space<vmem>>, vector<128x32xbf16>
    %cst = arith.constant dense<0.000000e+00> : vector<256x32xf32>
    %3 = tpu.matmul %1, %2, %cst {dimension_numbers = #tpu.dot_dimension_numbers<[1], [0], [0], [1], [0, 0, 1, 1], [], []>} : vector<256x128xbf16>, vector<128x32xbf16>, vector<256x32xf32> -> vector<256x32xf32>
    %c0_3 = arith.constant 0 : index
    %c0_4 = arith.constant 0 : index
    %4 = vector.load %arg3[%c0_3, %c0_4] : memref<1x32xf32, #tpu.memory_space<vmem>>, vector<1x32xf32>
    %5 = vector.broadcast %4 : vector<1x32xf32> to vector<256x32xf32>
    %6 = arith.addf %3, %5 : vector<256x32xf32>
    %cst_5 = arith.constant 0.000000e+00 : f32
    %7 = vector.broadcast %cst_5 : f32 to vector<256x32xf32>
    %8 = arith.maximumf %6, %7 : vector<256x32xf32>
    %9 = arith.truncf %8 : vector<256x32xf32> to vector<256x32xbf16>
    %c0_6 = arith.constant 0 : index
    %c0_7 = arith.constant 0 : index
    %10 = vector.load %arg4[%c0_6, %c0_7] : memref<32x128xbf16, #tpu.memory_space<vmem>>, vector<32x128xbf16>
    %cst_8 = arith.constant dense<0.000000e+00> : vector<256x128xf32>
    %11 = tpu.matmul %9, %10, %cst_8 {dimension_numbers = #tpu.dot_dimension_numbers<[1], [0], [0], [1], [0, 0, 1, 1], [], []>} : vector<256x32xbf16>, vector<32x128xbf16>, vector<256x128xf32> -> vector<256x128xf32>
    %c0_9 = arith.constant 0 : index
    %c0_10 = arith.constant 0 : index
    %12 = vector.load %arg5[%c0_9, %c0_10] : memref<1x128xf32, #tpu.memory_space<vmem>>, vector<1x128xf32>
    %13 = vector.broadcast %12 : vector<1x128xf32> to vector<256x128xf32>
    %14 = arith.addf %11, %13 : vector<256x128xf32>
    %c0_11 = arith.constant 0 : index
    %c0_12 = arith.constant 0 : index
    %15 = vector.load %arg6[%c0_11, %c0_12] : memref<32x128xbf16, #tpu.memory_space<vmem>>, vector<32x128xbf16>
    %cst_13 = arith.constant dense<0.000000e+00> : vector<256x128xf32>
    %16 = tpu.matmul %9, %15, %cst_13 {dimension_numbers = #tpu.dot_dimension_numbers<[1], [0], [0], [1], [0, 0, 1, 1], [], []>} : vector<256x32xbf16>, vector<32x128xbf16>, vector<256x128xf32> -> vector<256x128xf32>
    %c0_14 = arith.constant 0 : index
    %c0_15 = arith.constant 0 : index
    %17 = vector.load %arg7[%c0_14, %c0_15] : memref<1x128xf32, #tpu.memory_space<vmem>>, vector<1x128xf32>
    %18 = vector.broadcast %17 : vector<1x128xf32> to vector<256x128xf32>
    %19 = arith.addf %16, %18 : vector<256x128xf32>
    %cst_16 = arith.constant 0.000000e+00 : f32
    %20 = vector.broadcast %cst_16 : f32 to vector<256x128xf32>
    %21 = arith.subf %20, %14 : vector<256x128xf32>
    %22 = math.exp %21 : vector<256x128xf32>
    %cst_17 = arith.constant 1.000000e+00 : f32
    %23 = vector.broadcast %cst_17 : f32 to vector<256x128xf32>
    %24 = arith.addf %23, %22 : vector<256x128xf32>
    %cst_18 = arith.constant 1.000000e+00 : f32
    %25 = vector.broadcast %cst_18 : f32 to vector<256x128xf32>
    %26 = arith.divf %25, %24 : vector<256x128xf32>
    %27 = arith.mulf %0, %26 : vector<256x128xf32>
    %28 = arith.addf %27, %19 : vector<256x128xf32>
    %c0_19 = arith.constant 0 : index
    %c0_20 = arith.constant 0 : index
    %29 = vector.load %arg8[%c0_19, %c0_20] : memref<256x128xf32, #tpu.memory_space<vmem>>, vector<256x128xf32>
    tpu.vector_store %arg8[%c0_19, %c0_20], %28 {strides = array<i32>} : memref<256x128xf32, #tpu.memory_space<vmem>>, vector<256x128xf32>,
    return
  }
  func.func @transform_0(%arg0: i32) -> (i32, i32) {
    %c0_i32 = arith.constant 0 : i32
    %c0_i32_0 = arith.constant 0 : i32
    return %arg0, %c0_i32 : i32, i32
  }
  func.func @transform_1(%arg0: i32) -> (i32, i32) {
    %c0_i32 = arith.constant 0 : i32
    %c0_i32_0 = arith.constant 0 : i32
    %c0_i32_1 = arith.constant 0 : i32
    return %c0_i32, %c0_i32_0 : i32, i32
  }
  func.func @transform_2(%arg0: i32) -> (i32, i32) {
    %c0_i32 = arith.constant 0 : i32
    %c0_i32_0 = arith.constant 0 : i32
    %c0_i32_1 = arith.constant 0 : i32
    return %c0_i32, %c0_i32_0 : i32, i32
  }
  func.func @transform_3(%arg0: i32) -> (i32, i32) {
    %c0_i32 = arith.constant 0 : i32
    %c0_i32_0 = arith.constant 0 : i32
    %c0_i32_1 = arith.constant 0 : i32
    return %c0_i32, %c0_i32_0 : i32, i32
  }
  func.func @transform_4(%arg0: i32) -> (i32, i32) {
    %c0_i32 = arith.constant 0 : i32
    %c0_i32_0 = arith.constant 0 : i32
    %c0_i32_1 = arith.constant 0 : i32
    return %c0_i32, %c0_i32_0 : i32, i32
  }
  func.func @transform_5(%arg0: i32) -> (i32, i32) {
    %c0_i32 = arith.constant 0 : i32
    %c0_i32_0 = arith.constant 0 : i32
    %c0_i32_1 = arith.constant 0 : i32
    return %c0_i32, %c0_i32_0 : i32, i32
  }
  func.func @transform_6(%arg0: i32) -> (i32, i32) {
    %c0_i32 = arith.constant 0 : i32
    %c0_i32_0 = arith.constant 0 : i32
    %c0_i32_1 = arith.constant 0 : i32
    return %c0_i32, %c0_i32_0 : i32, i32
  }
  func.func @transform_7(%arg0: i32) -> (i32, i32) {
    %c0_i32 = arith.constant 0 : i32
    %c0_i32_0 = arith.constant 0 : i32
    return %arg0, %c0_i32 : i32, i32
  }
}

</mosaic_0001>

<bundles_post_ra>
// kernel: se_block.1
= control target key start
LH: loop header
LB: loop body
LE: loop exit
PB: predicated region body
PF: predicated region fallthrough
CT: control target
= control target key end

     0   :  { %12 = vsyncpa [#allocation3], 0  ;;  %s2594_s0 = inlined_call_operand.hbm [shape: f32[1024,128], index: 0, kind: input, shape index: {}]   ;;  %s2595_s1 = inlined_call_operand.vmem [shape: bf16[128,32], index: 1, kind: input, shape index: {}]   ;;  %s2596_s2 = inlined_call_operand.vmem [shape: f32[1,32], index: 2, kind: input, shape index: {}]   ;;  %s2597_s3 = inlined_call_operand.vmem [shape: bf16[32,128], index: 3, kind: input, shape index: {}]   ;;  %s2598_s4 = inlined_call_operand.vmem [shape: f32[1,128], index: 4, kind: input, shape index: {}]   ;;  %s2599_s5 = inlined_call_operand.vmem [shape: bf16[32,128], index: 5, kind: input, shape index: {}]   ;;  %s2600_s6 = inlined_call_operand.vmem [shape: f32[1,128], index: 6, kind: input, shape index: {}]   ;;  %s2601_s7 = inlined_call_operand.hbm [shape: f32[1024,128], index: 7, kind: output, shape index: {}]  }
   0x1   :  { %14 = vsyncpa [#allocation3 + $0x1], 0 }
   0x2   :  { %15 = vsyncpa [#allocation4], 0 }
   0x3   :  { %17 = vsyncpa [#allocation4 + $0x1], 0  ;;  %s2019_s24 = smov 0   ;;  %s2021_s25 = smov 0  }
   0x4   :  { %s2023_s26 = smov 0   ;;  %s2025_s27 = smov 0  }
   0x5 LB: > { %s2040_s28 = sadd.s32 4294967295, %s1971_s27   ;;  %s1420_s29 = sadd.s32 4294967294, %s1971_s27   ;;  %s1971_s27 = sphi %s2025_s27, %s2613_s27   ;;  %s1967_s26 = sphi %s2023_s26, %s2612_s26   ;;  %s1963_s25 = sphi %s2021_s25, %s2611_s25   ;;  %s1959_s24 = sphi %s2019_s24, %s2610_s24  }
   0x6   : > { %s2044_s30 = sadd.s32 1, %s1971_s27   ;;  %s30_s8 = sadd.s32 1, %s1967_s26 }
   0x7   : > { %s27_s9 = ssub.s32 %s1971_s27, %s2044_s30  ;;  %p37_p0 = scmp.ne.s32.totalorder %s1967_s26, %s1963_s25 }
   0x8   : > { %p28_p1 = scmp.eq.s32.totalorder %s27_s9, 0  ;;  %p38_p2 = scmp.eq.s32.totalorder %s1971_s27, 0 }
   0x9   : > { %p43_p3 = scmp.ne.s32.totalorder %s1963_s25, %s1959_s24  ;;  %p44_p4 = scmp.eq.s32.totalorder %s2040_s28, 0 }
   0xa   : > { %s2056_s10 = scalar_select %p28_p1, %s1967_s26, %s30_s8  }
   0xb   : > { %p2058_p5 = por %p38_p2, %p37_p0  ;;  %p2062_p6 = por %p44_p4, %p43_p3 }
   0xc   : > { %p193_p7 = scmp.eq.s32.totalorder %s2040_s28, 3  ;;  %p199_p8 = scmp.eq.s32.totalorder %s1420_s29, 3 }
   0xd   : > { %p1679_p9 = scmp.lt.s32.totalorder %s1971_s27, 4  ;;  %s237_s15 = sand.u32 1, %s1967_s26  }
   0xe   : > { %p2068_p10 = por %p193_p7, %p37_p0  ;;  %p2072_p11 = por %p199_p8, %p43_p3 }
   0xf   : > { %s1481_s16 = sshll.u32 %s1971_s27, 12  ;;  %s1423_s17 = sshll.u32 %s237_s15, 8 }
  0x10   : > { %s2605_s13 = scalar_select %p2068_p10, 1, 0 }
  0x11   : > { %s2606_s14 = scalar_select %p2072_p11, 1, 0 }
  0x12   : > { %s2081_s20 = scalar_lea.hbm %s2594_s0, %s1481_s16  ;;  %s241_s21 = scalar_lea.vmem [#allocation2], %s1423_s17 }
  0x13   : > { %s248_s22 = sshll.u32 %s241_s21, 4  ;;  %p2085_p12 = pnand %p1679_p9, %p2058_p5  ;;  %s2089_s22 = int_to_ptr.vmem [resolvable:$true] %s248_s22 }
  0x14   : > { %s2091_s29 = scalar_lea.sflag [#allocation3], %s237_s15  ;;  %s1875_s8 = scalar_lea.hbm %s2081_s20, 4096 }
  0x15   : > { %p1876_p13 = scmp.ne.s32.totalorder %s2081_s20, %s1875_s8  ;;  %p1877_p0 = pneg %p2085_p12 }
  0x16   : > { %s1880_s16 = scalar_lea.hbm %s2594_s0, 16384  ;;  %p1881_p3 = scmp.lt.u32.totalorder %s2081_s20, %s2594_s0 }
  0x17   : > { %p1878_p1 = pnand %p1877_p0, %p1876_p13  ;;  %p1882_p4 = scmp.lt.u32.totalorder %s1880_s16, %s1875_s8 }
  0x18   : > { %p1884_p7 = scmp.lt.u32.totalorder %s1875_s8, %s2081_s20 }
  0x19   : > { %p1879_p2 = pneg %p1878_p1  ;;  %p1883_p5 = por %p1882_p4, %p1881_p3 }
  0x1b   : > { %p1885_p8 = por %p1884_p7, %p1883_p5 }
  0x1d   : > { %p1886_p9 = pnand %p1885_p8, %p1879_p2 }
  0x1f   : > { %1889 = shalt.err (!%p1886_p9)
}
  0x20   : > { %s1890_s15 = scalar_lea.vmem %s2089_s22, 4096  ;;  %s1973_s19 = smov [#allocation2]  }
  0x21   : > { %p1891_p13 = scmp.ne.s32.totalorder %s2089_s22, %s1890_s15  ;;  %s1895_s21 = sshll.u32 %s1973_s19, 4  ;;  %s1896_s21 = int_to_ptr.vmem [resolvable:$false] %s1895_s21 }
  0x22   : > { %s1897_s9 = scalar_lea.vmem %s1896_s21, 8192  ;;  %p1898_p10 = scmp.lt.s32.totalorder %s2089_s22, %s1896_s21 }
  0x23   : > { %p1893_p1 = pnand %p1891_p13, %p1877_p0  ;;  %p1899_p3 = scmp.lt.s32.totalorder %s1897_s9, %s1890_s15 }
  0x25   : > { %p1894_p11 = pneg %p1893_p1  ;;  %p1900_p4 = por %p1899_p3, %p1898_p10 }
  0x27   : > { %p1901_p5 = pnand %p1900_p4, %p1894_p11 }
  0x29   : > { %1904 = shalt.err (!%p1901_p5)
}
  0x2a   : > { %s1974_s8 = smov 128   ;;  %s1975_s11 = smov 8  }
  0x2b   : > { %1674 = dma.hbm_to_vmem [thread:$0]  (!%p2085_p12), %s2081_s20, 4096, %s2089_s22, %s2091_s29, %s1974_s8, %s1974_s8, %s1975_s11  }
  0x2c   : > { %p1426_p0 = scmp.ge.s32.totalorder %s1971_s27, 1  ;;  %p256_p2 = scmp.lt.s32.totalorder %s1971_s27, 5 }
  0x2e   : > { %p257_p7 = pnand %p1426_p0, %p256_p2 }
  0x2f   : > { %s2122_s16 = sand.u32 (!%p257_p7), 1, %s1963_s25  }
  0x30   : > { %260 = sbr.rel (%p257_p7) target bundleno = 665 (0x299), region = 48  ;;  %s1427_s17 = sshll.u32 (!%p257_p7), %s2122_s16, 8 }
  0x31   : > { %s263_s18 = scalar_lea.sflag (!%p257_p7), [#allocation3], %s2122_s16  ;;  %s2128_s15 = scalar_lea.vmem (!%p257_p7), [#allocation2], %s1427_s17 }
  0x37   : > { %1950 = dma.done.wait (%p2062_p6), %s263_s18, 4096  }
  0x38   : > { %1952 = vsyncadd (%p2062_p6), %s263_s18, 4294963200  ;;  %v1717_v0 = vld [vmem:[%s2595_s1] sm:$0xff]   ;;  %v1718_v1 = vld [vmem:[%s2595_s1 + $0x8] sm:$0xff]   ;;  %vm651_vm0 = vcmask 261120   ;;  %s2426_s8 = scalar_lea.vmem [#allocation5], %s1427_s17  ;;  %s1482_s17 = sshll.u32 %s2040_s28, 12 }
  0x39   : > { %1543 = vmatprep.subr.bf16.mxu0 %v1717_v0  ;;  %v1719_v2 = vld [vmem:[%s2595_s1 + $0x10] sm:$0xff]   ;;  %v1720_v3 = vld [vmem:[%s2595_s1 + $0x18] sm:$0xff]   ;;  %v2147_v4 = vld [vmem:[%s2128_s15] sm:$0xff]  ;;  %s1347_s11 = sshll.u32 %s2426_s8, 4  ;;  %s2546_s20 = scalar_lea.hbm %s2601_s7, %s1482_s17  ;;  %s2548_s11 = int_to_ptr.vmem [resolvable:$true] %s1347_s11 }
  0x3a   : > { %1544 = vmatpush3.bf16.msra.mxu0 %v1717_v0  ;;  %v2150_v5 = vld [vmem:[%s2128_s15 + $0x8] sm:$0xff]  ;;  %v1721_v7 = vld [vmem:[%s2595_s1 + $0x20] sm:$0xff]   ;;  %v1723_v9 = vld [vmem:[%s2595_s1 + $0x30] sm:$0xff]   ;;  %s1334_s22 = scalar_lea.sflag [#allocation4], %s2122_s16  ;;  %s1905_s23 = scalar_lea.vmem %s2548_s11, 4096 }
  0x3b   : > { %1545 = vmatprep.subr.bf16.mxu0 %v1718_v1  ;;  %v332_v6 = vpack.c.bf16 %v2150_v5, %v2147_v4  ;;  %v1722_v8 = vld [vmem:[%s2595_s1 + $0x28] sm:$0xff]   ;;  %v1724_v10 = vld [vmem:[%s2595_s1 + $0x38] sm:$0xff]   ;;  %v2167_v11 = vld [vmem:[%s2128_s15 + $0x10] sm:$0xff]  ;;  %p1906_p6 = scmp.ne.s32.totalorder %s2548_s11, %s1905_s23  ;;  %p2608_p10 = scmp.ne.s32.totalorder %s2605_s13, 0 }
  0x3c   : > { %v2170_v12 = vld [vmem:[%s2128_s15 + $0x18] sm:$0xff]  ;;  %v2173_v13 = vld [vmem:[%s2128_s15 + $0x20] sm:$0xff]  ;;  %v2176_v14 = vld [vmem:[%s2128_s15 + $0x28] sm:$0xff] }
  0x3d   : > { %1559 = vmatprep.mubr.bf16.mxu0 %v332_v6  ;;  %v333_v15 = vpack.c.bf16 %v2170_v12, %v2167_v11  ;;  %v334_v16 = vpack.c.bf16 %v2176_v14, %v2173_v13  ;;  %v2183_v17 = vld [vmem:[%s2128_s15 + $0x30] sm:$0xff]  ;;  %v2186_v18 = vld [vmem:[%s2128_s15 + $0x38] sm:$0xff]  ;;  %v2189_v19 = vld [vmem:[%s2128_s15 + $0x40] sm:$0xff]  ;;  %p1907_p11 = pnand %p1906_p6, %p2608_p10 }
  0x3e   : > { %1546 = vmatpush3.bf16.msra.mxu0 %v1718_v1  ;;  %v2192_v20 = vld [vmem:[%s2128_s15 + $0x48] sm:$0xff]  ;;  %v335_v21 = vpack.c.bf16 %v2186_v18, %v2183_v17  ;;  %v2199_v23 = vld [vmem:[%s2128_s15 + $0x50] sm:$0xff]  ;;  %v2202_v24 = vld [vmem:[%s2128_s15 + $0x58] sm:$0xff] }
  0x3f   : > { %1547 = vmatprep.subr.bf16.mxu0 %v1719_v2  ;;  %v336_v22 = vpack.c.bf16 %v2192_v20, %v2189_v19  ;;  %v312_v25 = vld [vmem:[%s2128_s15 + $0x60] sm:$0xff]  ;;  %v313_v26 = vld [vmem:[%s2128_s15 + $0x68] sm:$0xff]  ;;  %v337_v27 = vpack.c.bf16 %v2202_v24, %v2199_v23  ;;  %v2209_v29 = vld [vmem:[%s2128_s15 + $0x70] sm:$0xff]  ;;  %p1908_p12 = pneg %p1907_p11 }
  0x40   : > { %v338_v28 = vpack.c.bf16 %v313_v26, %v312_v25  ;;  %v2212_v30 = vld [vmem:[%s2128_s15 + $0x78] sm:$0xff]  ;;  %v316_v31 = vld [vmem:[%s2128_s15 + $0x80] sm:$0xff]  ;;  %v317_v32 = vld [vmem:[%s2128_s15 + $0x88] sm:$0xff] }
  0x41   : > { %v339_v33 = vpack.c.bf16 %v2212_v30, %v2209_v29  ;;  %v340_v34 = vpack.c.bf16 %v317_v32, %v316_v31  ;;  %v318_v35 = vld [vmem:[%s2128_s15 + $0x90] sm:$0xff]  ;;  %v319_v36 = vld [vmem:[%s2128_s15 + $0x98] sm:$0xff]  ;;  %v320_v37 = vld [vmem:[%s2128_s15 + $0xa0] sm:$0xff] }
  0x42   : > { %1548 = vmatpush3.bf16.msra.mxu0 %v1719_v2  ;;  %v321_v38 = vld [vmem:[%s2128_s15 + $0xa8] sm:$0xff]  ;;  %v341_v39 = vpack.c.bf16 %v319_v36, %v318_v35  ;;  %v322_v41 = vld [vmem:[%s2128_s15 + $0xb0] sm:$0xff]  ;;  %v323_v42 = vld [vmem:[%s2128_s15 + $0xb8] sm:$0xff] }
  0x43   : > { %1549 = vmatprep.subr.bf16.mxu0 %v1720_v3  ;;  %v342_v40 = vpack.c.bf16 %v321_v38, %v320_v37  ;;  %v324_v43 = vld [vmem:[%s2128_s15 + $0xc0] sm:$0xff]  ;;  %v325_v44 = vld [vmem:[%s2128_s15 + $0xc8] sm:$0xff]  ;;  %v343_v45 = vpack.c.bf16 %v323_v42, %v322_v41  ;;  %v326_v47 = vld [vmem:[%s2128_s15 + $0xd0] sm:$0xff] }
  0x44   : > { %v344_v46 = vpack.c.bf16 %v325_v44, %v324_v43  ;;  %v327_v48 = vld [vmem:[%s2128_s15 + $0xd8] sm:$0xff]  ;;  %v328_v49 = vld [vmem:[%s2128_s15 + $0xe0] sm:$0xff]  ;;  %v329_v50 = vld [vmem:[%s2128_s15 + $0xe8] sm:$0xff] }
  0x45   : > { %v345_v51 = vpack.c.bf16 %v327_v48, %v326_v47  ;;  %v346_v52 = vpack.c.bf16 %v329_v50, %v328_v49  ;;  %v330_v53 = vld [vmem:[%s2128_s15 + $0xf0] sm:$0xff]  ;;  %v331_v54 = vld [vmem:[%s2128_s15 + $0xf8] sm:$0xff]  ;;  %v1725_v56 = vld [vmem:[%s2597_s3] sm:$0xff]  }
  0x46   : > { %1550 = vmatpush3.bf16.msra.mxu0 %v1720_v3  ;;  %v347_v55 = vpack.c.bf16 %v331_v54, %v330_v53  ;;  %1663 = vmatprep.subr.bf16.mxu1 %v1725_v56  ;;  %v1726_v57 = vld [vmem:[%s2597_s3 + $0x8] sm:$0xff]   ;;  %v1727_v58 = vld [vmem:[%s2599_s5] sm:$0xff]  }
  0x47   : > { %1551 = vmatprep.subr.bf16.mxu0 %v1721_v7  ;;  %1665 = vmatpush3.bf16.msra.mxu1 %v1725_v56  ;;  %v2244_v59 = vld [vmem:[%s2596_s2] ss:$0 sm:$0xff] }
  0x48   : > { %1664 = vmatprep.subr.bf16.mxu1 %v1726_v57 }
  0x4a   : > { %1552 = vmatpush3.bf16.msra.mxu0 %v1721_v7 }
  0x4b   : > { %1553 = vmatprep.subr.bf16.mxu0 %v1722_v8  ;;  %1666 = vmatpush3.bf16.msra.mxu1 %v1726_v57 }
  0x4c   : > { %1627 = vmatprep.subr.bf16.mxu1 %v1727_v58 }
  0x4e   : > { %1554 = vmatpush3.bf16.msra.mxu0 %v1722_v8 }
  0x4f   : > { %1555 = vmatprep.subr.bf16.mxu0 %v1723_v9 }
  0x52   : > { %1556 = vmatpush3.bf16.msra.mxu0 %v1723_v9 }
  0x53   : > { %1557 = vmatprep.subr.bf16.mxu0 %v1724_v10 }
  0x56   : > { %1558 = vmatpush3.bf16.msra.mxu0 %v1724_v10 }
  0x57   : > { %1591 = vmatprep.subr.bf16.mxu0 %v1725_v56 }
  0x59   : > { %1560 = vmatmul.mubr.bf16.vlgmr.msra.gmra.mrb[0].mxu0 %v333_v15 }
  0x5a   : > { %1563 = vmatprep.mubr.bf16.mxu0 %v334_v16  ;;  %1592 = vmatpush3.bf16.msra.mxu0 %v1725_v56 }
  0x5b   : > { %1593 = vmatprep.subr.bf16.mxu0 %v1726_v57 }
  0x5e   : > { %1594 = vmatpush3.bf16.msra.mxu0 %v1726_v57 }
  0x61   : > { %1564 = vmatmul.mubr.bf16.gmra.mrb[4].mxu0 %v335_v21 }
  0x62   : > { %1567 = vmatprep.mubr.bf16.mxu0 %v336_v22 }
  0x69   : > { %1568 = vmatmul.mubr.bf16.gmra.mrb[8].mxu0 %v337_v27 }
  0x6a   : > { %1571 = vmatprep.mubr.bf16.mxu0 %v338_v28 }
  0x71   : > { %1572 = vmatmul.mubr.bf16.gmra.mrb[12].mxu0 %v339_v33 }
  0x72   : > { %1575 = vmatprep.mubr.bf16.mxu0 %v340_v34 }
  0x79   : > { %1576 = vmatmul.mubr.bf16.gmra.mrb[16].mxu0 %v341_v39 }
  0x7a   : > { %1579 = vmatprep.mubr.bf16.mxu0 %v342_v40 }
  0x81   : > { %1580 = vmatmul.mubr.bf16.gmra.mrb[20].mxu0 %v343_v45 }
  0x82   : > { %1583 = vmatprep.mubr.bf16.mxu0 %v344_v46 }
  0x89   : > { %1584 = vmatmul.mubr.bf16.gmra.mrb[24].mxu0 %v345_v51 }
  0x8a   : > { %1587 = vmatprep.mubr.bf16.mxu0 %v346_v52 }
  0x91   : > { %1588 = vmatmul.mubr.bf16.gmra.mrb[28].mxu0 %v347_v55  ;;  %v1728_v55 = vld [vmem:[%s2599_s5 + $0x8] sm:$0xff]  }
 0x12c   : > { %v1561_v60 = vpop.f32.mrb[0].mxu0 }
 0x12d   : > { %v462_v61 = vadd.f32 %v1561_v60, %v2244_v59  ;;  %v453_v62 = vpop.f32.mrb[1].mxu0 }
 0x12e   : > { %v454_v63 = vadd.f32 %v2244_v59, %v453_v62  ;;  %v1562_v0 = vpop.f32.mrb[2].mxu0 }
 0x12f   : > { %v465_v1 = vadd.f32 %v1562_v0, %v2244_v59  ;;  %v456_v2 = vpop.f32.mrb[3].mxu0  ;;  %v582_v6 = vmax.f32 %v462_v61, 0.0 }
 0x130   : > { %v457_v3 = vadd.f32 %v2244_v59, %v456_v2  ;;  %v580_v8 = vmax.f32 %v454_v63, 0.0 }
 0x131   : > { %v583_v7 = vmax.f32 %v465_v1, 0.0 }
 0x132   : > { %v581_v9 = vmax.f32 %v457_v3, 0.0 }
 0x133   : > { %v2250_v10 = vpack.c.bf16 %v583_v7, %v582_v6 }
 0x134   : > { %v2252_v15 = vpack.c.bf16 %v581_v9, %v580_v8  ;;  %v1565_v16 = vpop.f32.mrb[4].mxu0 }
 0x135   : > { %v478_v21 = vadd.f32 %v1565_v16, %v2244_v59  ;;  %v469_v22 = vpop.f32.mrb[5].mxu0 }
 0x136   : > { %v470_v25 = vadd.f32 %v2244_v59, %v469_v22  ;;  %v1566_v26 = vpop.f32.mrb[6].mxu0  ;;  %1595 = vmatprep.mubr.msk.bf16.mxu0 %vm651_vm0, %v2252_v15 }
 0x137   : > { %v481_v27 = vadd.f32 %v1566_v26, %v2244_v59  ;;  %v472_v28 = vpop.f32.mrb[7].mxu0  ;;  %1596 = vmatmul.mubr.msk.bf16.vlgmr.msra.gmra.mrb[32].mxu0 %vm651_vm0, %v2250_v10  ;;  %v586_v32 = vmax.f32 %v478_v21, 0.0 }
 0x138   : > { %v473_v31 = vadd.f32 %v2244_v59, %v472_v28  ;;  %v584_v34 = vmax.f32 %v470_v25, 0.0 }
 0x139   : > { %v587_v33 = vmax.f32 %v481_v27, 0.0 }
 0x13a   : > { %v585_v35 = vmax.f32 %v473_v31, 0.0 }
 0x13b   : > { %v2262_v36 = vpack.c.bf16 %v587_v33, %v586_v32 }
 0x13c   : > { %v2264_v37 = vpack.c.bf16 %v585_v35, %v584_v34  ;;  %v1569_v38 = vpop.f32.mrb[8].mxu0 }
 0x13d   : > { %v494_v39 = vadd.f32 %v1569_v38, %v2244_v59  ;;  %v485_v40 = vpop.f32.mrb[9].mxu0 }
 0x13e   : > { %v486_v41 = vadd.f32 %v2244_v59, %v485_v40  ;;  %v1570_v42 = vpop.f32.mrb[10].mxu0  ;;  %1599 = vmatprep.mubr.msk.bf16.mxu0 %vm651_vm0, %v2264_v37 }
 0x13f   : > { %v497_v43 = vadd.f32 %v1570_v42, %v2244_v59  ;;  %v488_v44 = vpop.f32.mrb[11].mxu0  ;;  %1600 = vmatmul.mubr.msk.bf16.gmra.mrb[36].mxu0 %vm651_vm0, %v2262_v36  ;;  %v590_v46 = vmax.f32 %v494_v39, 0.0 }
 0x140   : > { %v489_v45 = vadd.f32 %v2244_v59, %v488_v44  ;;  %v588_v48 = vmax.f32 %v486_v41, 0.0 }
 0x141   : > { %v591_v47 = vmax.f32 %v497_v43, 0.0 }
 0x142   : > { %v589_v49 = vmax.f32 %v489_v45, 0.0 }
 0x143   : > { %v2274_v50 = vpack.c.bf16 %v591_v47, %v590_v46 }
 0x144   : > { %v1573_v51 = vpop.f32.mrb[12].mxu0  ;;  %v2276_v52 = vpack.c.bf16 %v589_v49, %v588_v48 }
 0x145   : > { %v510_v53 = vadd.f32 %v1573_v51, %v2244_v59  ;;  %v501_v54 = vpop.f32.mrb[13].mxu0 }
 0x146   : > { %v502_v56 = vadd.f32 %v2244_v59, %v501_v54  ;;  %v1574_v57 = vpop.f32.mrb[14].mxu0  ;;  %1603 = vmatprep.mubr.msk.bf16.mxu1 %vm651_vm0, %v2276_v52 }
 0x147   : > { %v513_v60 = vadd.f32 %v1574_v57, %v2244_v59  ;;  %v504_v61 = vpop.f32.mrb[15].mxu0  ;;  %1604 = vmatmul.mubr.msk.bf16.vlgmr.msra.gmra.mrb[0].mxu1 %vm651_vm0, %v2274_v50  ;;  %v594_v63 = vmax.f32 %v510_v53, 0.0 }
 0x148   : > { %v505_v62 = vadd.f32 %v2244_v59, %v504_v61  ;;  %1628 = vmatpush3.bf16.msra.mxu1 %v1727_v58  ;;  %v592_v1 = vmax.f32 %v502_v56, 0.0 }
 0x149   : > { %v595_v0 = vmax.f32 %v513_v60, 0.0  ;;  %1629 = vmatprep.subr.bf16.mxu1 %v1728_v55 }
 0x14a   : > { %v593_v2 = vmax.f32 %v505_v62, 0.0 }
 0x14b   : > { %v2289_v3 = vpack.c.bf16 %v595_v0, %v594_v63 }
 0x14c   : > { %v2291_v6 = vpack.c.bf16 %v593_v2, %v592_v1  ;;  %v1577_v7 = vpop.f32.mrb[16].mxu0  ;;  %1630 = vmatpush3.bf16.msra.mxu1 %v1728_v55 }
 0x14d   : > { %v526_v8 = vadd.f32 %v1577_v7, %v2244_v59  ;;  %v517_v9 = vpop.f32.mrb[17].mxu0 }
 0x14e   : > { %v518_v16 = vadd.f32 %v2244_v59, %v517_v9  ;;  %v1578_v21 = vpop.f32.mrb[18].mxu0  ;;  %1607 = vmatprep.mubr.msk.bf16.mxu1 %vm651_vm0, %v2291_v6 }
 0x14f   : > { %v529_v58 = vadd.f32 %v1578_v21, %v2244_v59  ;;  %v520_v22 = vpop.f32.mrb[19].mxu0  ;;  %1608 = vmatmul.mubr.msk.bf16.gmra.mrb[4].mxu1 %vm651_vm0, %v2289_v3  ;;  %v598_v26 = vmax.f32 %v526_v8, 0.0 }
 0x150   : > { %v521_v25 = vadd.f32 %v2244_v59, %v520_v22  ;;  %v596_v28 = vmax.f32 %v518_v16, 0.0 }
 0x151   : > { %v599_v27 = vmax.f32 %v529_v58, 0.0 }
 0x152   : > { %v597_v31 = vmax.f32 %v521_v25, 0.0 }
 0x153   : > { %v621_v32 = vpack.c.bf16 %v599_v27, %v598_v26 }
 0x154   : > { %v620_v33 = vpack.c.bf16 %v597_v31, %v596_v28  ;;  %v1581_v34 = vpop.f32.mrb[20].mxu0 }
 0x155   : > { %v542_v35 = vadd.f32 %v1581_v34, %v2244_v59  ;;  %v533_v38 = vpop.f32.mrb[21].mxu0 }
 0x156   : > { %v534_v39 = vadd.f32 %v2244_v59, %v533_v38  ;;  %v1582_v40 = vpop.f32.mrb[22].mxu0  ;;  %1611 = vmatprep.mubr.msk.bf16.mxu1 %vm651_vm0, %v620_v33 }
 0x157   : > { %v545_v41 = vadd.f32 %v1582_v40, %v2244_v59  ;;  %v536_v42 = vpop.f32.mrb[23].mxu0  ;;  %1612 = vmatmul.mubr.msk.bf16.gmra.mrb[8].mxu1 %vm651_vm0, %v621_v32  ;;  %v602_v44 = vmax.f32 %v542_v35, 0.0 }
 0x158   : > { %v537_v43 = vadd.f32 %v2244_v59, %v536_v42  ;;  %v600_v46 = vmax.f32 %v534_v39, 0.0 }
 0x159   : > { %v603_v45 = vmax.f32 %v545_v41, 0.0 }
 0x15a   : > { %v601_v47 = vmax.f32 %v537_v43, 0.0 }
 0x15b   : > { %v623_v48 = vpack.c.bf16 %v603_v45, %v602_v44 }
 0x15c   : > { %v622_v49 = vpack.c.bf16 %v601_v47, %v600_v46  ;;  %v1585_v51 = vpop.f32.mrb[24].mxu0 }
 0x15d   : > { %v558_v53 = vadd.f32 %v1585_v51, %v2244_v59  ;;  %v549_v54 = vpop.f32.mrb[25].mxu0 }
 0x15e   : > { %v550_v55 = vadd.f32 %v2244_v59, %v549_v54  ;;  %v1586_v56 = vpop.f32.mrb[26].mxu0  ;;  %1615 = vmatprep.mubr.msk.bf16.mxu1 %vm651_vm0, %v622_v49 }
 0x15f   : > { %v561_v57 = vadd.f32 %v1586_v56, %v2244_v59  ;;  %v552_v60 = vpop.f32.mrb[27].mxu0  ;;  %1616 = vmatmul.mubr.msk.bf16.gmra.mrb[12].mxu1 %vm651_vm0, %v623_v48  ;;  %v606_v62 = vmax.f32 %v558_v53, 0.0 }
 0x160   : > { %v553_v61 = vadd.f32 %v2244_v59, %v552_v60  ;;  %v604_v0 = vmax.f32 %v550_v55, 0.0 }
 0x161   : > { %v607_v63 = vmax.f32 %v561_v57, 0.0 }
 0x162   : > { %v605_v1 = vmax.f32 %v553_v61, 0.0 }
 0x163   : > { %v625_v2 = vpack.c.bf16 %v607_v63, %v606_v62 }
 0x164   : > { %v624_v7 = vpack.c.bf16 %v605_v1, %v604_v0  ;;  %v1589_v8 = vpop.f32.mrb[28].mxu0 }
 0x165   : > { %v574_v9 = vadd.f32 %v1589_v8, %v2244_v59  ;;  %v565_v16 = vpop.f32.mrb[29].mxu0 }
 0x166   : > { %v566_v21 = vadd.f32 %v2244_v59, %v565_v16  ;;  %v1590_v58 = vpop.f32.mrb[30].mxu0  ;;  %1619 = vmatprep.mubr.msk.bf16.mxu1 %vm651_vm0, %v624_v7 }
 0x167   : > { %v577_v22 = vadd.f32 %v1590_v58, %v2244_v59  ;;  %v568_v25 = vpop.f32.mrb[31].mxu0  ;;  %1620 = vmatmul.mubr.msk.bf16.gmra.mrb[16].mxu1 %vm651_vm0, %v625_v2  ;;  %v610_v27 = vmax.f32 %v574_v9, 0.0 }
 0x168   : > { %v569_v26 = vadd.f32 %v2244_v59, %v568_v25  ;;  %v608_v31 = vmax.f32 %v566_v21, 0.0 }
 0x169   : > { %v611_v28 = vmax.f32 %v577_v22, 0.0 }
 0x16a   : > { %v609_v34 = vmax.f32 %v569_v26, 0.0 }
 0x16b   : > { %v627_v35 = vpack.c.bf16 %v611_v28, %v610_v27 }
 0x16c   : > { %v626_v38 = vpack.c.bf16 %v609_v34, %v608_v31 }
 0x16e   : > { %1623 = vmatprep.mubr.msk.bf16.mxu1 %vm651_vm0, %v626_v38 }
 0x16f   : > { %1624 = vmatmul.mubr.msk.bf16.gmra.mrb[20].mxu1 %vm651_vm0, %v627_v35 }
 0x170   : > { %1631 = vmatprep.mubr.msk.bf16.mxu1 %vm651_vm0, %v2252_v15 }
 0x177   : > { %1632 = vmatmul.mubr.msk.bf16.vlgmr.msra.gmra.mrb[24].mxu1 %vm651_vm0, %v2250_v10 }
 0x178   : > { %1635 = vmatprep.mubr.msk.bf16.mxu1 %vm651_vm0, %v2264_v37 }
 0x17f   : > { %1636 = vmatmul.mubr.msk.bf16.gmra.mrb[28].mxu1 %vm651_vm0, %v2262_v36 }
 0x180   : > { %1639 = vmatprep.mubr.msk.bf16.mxu1 %vm651_vm0, %v2276_v52 }
 0x187   : > { %1640 = vmatmul.mubr.msk.bf16.gmra.mrb[32].mxu1 %vm651_vm0, %v2274_v50 }
 0x188   : > { %1643 = vmatprep.mubr.msk.bf16.mxu1 %vm651_vm0, %v2291_v6  ;;  %v2348_v6 = vld [vmem:[%s2598_s4] ss:$0 sm:$0xff] }
 0x18f   : > { %1644 = vmatmul.mubr.msk.bf16.gmra.mrb[36].mxu1 %vm651_vm0, %v2289_v3 }
 0x190   : > { %1647 = vmatprep.mubr.msk.bf16.mxu1 %vm651_vm0, %v620_v33 }
 0x197   : > { %1648 = vmatmul.mubr.msk.bf16.gmra.mrb[40].mxu1 %vm651_vm0, %v621_v32 }
 0x198   : > { %1651 = vmatprep.mubr.msk.bf16.mxu1 %vm651_vm0, %v622_v49 }
 0x19f   : > { %1652 = vmatmul.mubr.msk.bf16.gmra.mrb[44].mxu1 %vm651_vm0, %v623_v48 }
 0x1a0   : > { %1655 = vmatprep.mubr.msk.bf16.mxu1 %vm651_vm0, %v624_v7 }
 0x1a7   : > { %1656 = vmatmul.mubr.msk.bf16.gmra.mrb[48].mxu1 %vm651_vm0, %v625_v2 }
 0x1a8   : > { %1659 = vmatprep.mubr.msk.bf16.mxu1 %vm651_vm0, %v626_v38 }
 0x1af   : > { %1660 = vmatmul.mubr.msk.bf16.gmra.mrb[52].mxu1 %vm651_vm0, %v627_v35 }
 0x20a   : > { %v1597_v59 = vpop.f32.mrb[32].mxu0 }
 0x20b   : > { %v734_v10 = vpop.f32.mrb[33].mxu0  ;;  %v743_v32 = vadd.f32 %v1597_v59, %v2348_v6 }
 0x20c   : > { %v1598_v15 = vpop.f32.mrb[34].mxu0  ;;  %v735_v39 = vadd.f32 %v2348_v6, %v734_v10 }
 0x20d   : > { %v737_v36 = vpop.f32.mrb[35].mxu0  ;;  %v746_v41 = vadd.f32 %v1598_v15, %v2348_v6  ;;  %v1047_v44 = vsub.f32 0.0, %v743_v32 }
 0x20e   : > { %v738_v45 = vadd.f32 %v2348_v6, %v737_v36  ;;  %v1045_v46 = vsub.f32 0.0, %v735_v39 }
 0x20f   : > { %v1048_v47 = vsub.f32 0.0, %v746_v41  ;;  %v1081_v48 = vmul.f32 1.442695, %v1047_v44 }
 0x210   : > { %v1046_v49 = vsub.f32 0.0, %v738_v45  ;;  %v1077_v53 = vmul.f32 1.442695, %v1045_v46 }
 0x211   : > { %v1083_v55 = vmul.f32 1.442695, %v1048_v47  ;;  %1729 = vpow2.f32 %v1081_v48 }
 0x212   : > { %v1601_v37 = vpop.f32.mrb[36].mxu0  ;;  %v1079_v62 = vmul.f32 1.442695, %v1046_v49  ;;  %1731 = vpow2.f32 %v1077_v53 }
 0x213   : > { %v750_v50 = vpop.f32.mrb[37].mxu0  ;;  %v759_v56 = vadd.f32 %v1601_v37, %v2348_v6  ;;  %1733 = vpow2.f32 %v1083_v55 }
 0x214   : > { %v1602_v52 = vpop.f32.mrb[38].mxu0  ;;  %v751_v60 = vadd.f32 %v2348_v6, %v750_v50  ;;  %1735 = vpow2.f32 %v1079_v62 }
 0x215   : > { %v753_v3 = vpop.f32.mrb[39].mxu0  ;;  %v762_v63 = vadd.f32 %v1602_v52, %v2348_v6  ;;  %v1051_v1 = vsub.f32 0.0, %v759_v56 }
 0x216   : > { %v754_v0 = vadd.f32 %v2348_v6, %v753_v3  ;;  %v1049_v7 = vsub.f32 0.0, %v751_v60 }
 0x217   : > { %v1052_v9 = vsub.f32 0.0, %v762_v63  ;;  %v1089_v25 = vmul.f32 1.442695, %v1051_v1 }
 0x218   : > { %v1050_v58 = vsub.f32 0.0, %v754_v0  ;;  %v1085_v28 = vmul.f32 1.442695, %v1049_v7 }
 0x219   : > { %v1091_v35 = vmul.f32 1.442695, %v1052_v9  ;;  %1737 = vpow2.f32 %v1089_v25 }
 0x21a   : > { %v1605_v33 = vpop.f32.mrb[0].mxu1  ;;  %v1087_v10 = vmul.f32 1.442695, %v1050_v58  ;;  %1739 = vpow2.f32 %v1085_v28 }
 0x21b   : > { %v766_v40 = vpop.f32.mrb[1].mxu1  ;;  %v775_v2 = vadd.f32 %v1605_v33, %v2348_v6  ;;  %v1730_v15 = vpop.eup %1729  ;;  %1741 = vpow2.f32 %v1091_v35 }
 0x21c   : > { %v1606_v42 = vpop.f32.mrb[2].mxu1  ;;  %v767_v8 = vadd.f32 %v2348_v6, %v766_v40  ;;  %v1732_v50 = vpop.eup %1731  ;;  %1743 = vpow2.f32 %v1087_v10 }
 0x21d   : > { %v769_v43 = vpop.f32.mrb[3].mxu1  ;;  %v778_v16 = vadd.f32 %v1606_v42, %v2348_v6  ;;  %v1055_v26 = vsub.f32 0.0, %v775_v2  ;;  %v1734_v32 = vpop.eup %1733  ;;  %v1143_v42 = vadd.f32 1.0, %v1730_v15  ;;  %v1141_v46 = vadd.f32 1.0, %v1732_v50 }
 0x21e   : > { %v1053_v31 = vsub.f32 0.0, %v767_v8  ;;  %v770_v59 = vadd.f32 %v2348_v6, %v769_v43  ;;  %v1736_v45 = vpop.eup %1735  ;;  %v1144_v49 = vadd.f32 1.0, %v1734_v32 }
 0x21f   : > { %v1056_v38 = vsub.f32 0.0, %v778_v16  ;;  %v1097_v36 = vmul.f32 1.442695, %v1055_v26  ;;  %v1142_v56 = vadd.f32 1.0, %v1736_v45 }
 0x220   : > { %v1093_v52 = vmul.f32 1.442695, %v1053_v31  ;;  %v1054_v39 = vsub.f32 0.0, %v770_v59 }
 0x221   : > { %v1099_v33 = vmul.f32 1.442695, %v1056_v38  ;;  %1745 = vpow2.f32 %v1097_v36 }
 0x222   : > { %v1609_v51 = vpop.f32.mrb[4].mxu1  ;;  %1747 = vpow2.f32 %v1093_v52 }
 0x223   : > { %v782_v54 = vpop.f32.mrb[5].mxu1  ;;  %v791_v37 = vadd.f32 %v1609_v51, %v2348_v6  ;;  %1749 = vpow2.f32 %v1099_v33  ;;  %v1738_v62 = vpop.eup %1737 }
 0x224   : > { %v1610_v57 = vpop.f32.mrb[6].mxu1  ;;  %v783_v3 = vadd.f32 %v2348_v6, %v782_v54  ;;  %v1095_v54 = vmul.f32 1.442695, %v1054_v39  ;;  %1751 = vrcp.f32 %v1143_v42  ;;  %v1740_v1 = vpop.eup %1739  ;;  %v1147_v25 = vadd.f32 1.0, %v1738_v62 }
 0x225   : > { %v785_v61 = vpop.f32.mrb[7].mxu1  ;;  %v794_v40 = vadd.f32 %v1610_v57, %v2348_v6  ;;  %v1059_v47 = vsub.f32 0.0, %v791_v37  ;;  %1753 = vrcp.f32 %v1141_v46  ;;  %v1742_v8 = vpop.eup %1741  ;;  %v1145_v35 = vadd.f32 1.0, %v1740_v1 }
 0x226   : > { %v786_v43 = vadd.f32 %v2348_v6, %v785_v61  ;;  %v1057_v51 = vsub.f32 0.0, %v783_v3  ;;  %1755 = vrcp.f32 %v1144_v49  ;;  %v1744_v58 = vpop.eup %1743  ;;  %v1148_v10 = vadd.f32 1.0, %v1742_v8 }
 0x227   : > { %v1060_v55 = vsub.f32 0.0, %v794_v40  ;;  %v1105_v60 = vmul.f32 1.442695, %v1059_v47  ;;  %1757 = vpow2.f32 %v1095_v54  ;;  %v1146_v15 = vadd.f32 1.0, %v1744_v58 }
 0x228   : > { %v1058_v57 = vsub.f32 0.0, %v786_v43  ;;  %v1101_v61 = vmul.f32 1.442695, %v1057_v51  ;;  %1759 = vrcp.f32 %v1142_v56 }
 0x229   : > { %v1107_v63 = vmul.f32 1.442695, %v1060_v55  ;;  %1761 = vpow2.f32 %v1105_v60 }
 0x22a   : > { %v1613_v21 = vpop.f32.mrb[8].mxu1  ;;  %v1103_v2 = vmul.f32 1.442695, %v1058_v57  ;;  %1763 = vpow2.f32 %v1101_v61 }
 0x22b   : > { %v2361_v22 = vpop.f32.mrb[9].mxu1  ;;  %v807_v9 = vadd.f32 %v1613_v21, %v2348_v6  ;;  %v1746_v31 = vpop.eup %1745  ;;  %1765 = vpow2.f32 %v1107_v63 }
 0x22c   : > { %v2363_v27 = vpop.f32.mrb[10].mxu1  ;;  %v799_v26 = vadd.f32 %v2348_v6, %v2361_v22  ;;  %v1748_v59 = vpop.eup %1747  ;;  %1767 = vpow2.f32 %v1103_v2  ;;  %v1151_v22 = vadd.f32 1.0, %v1746_v31 }
 0x22d   : > { %v2365_v34 = vpop.f32.mrb[11].mxu1  ;;  %v810_v38 = vadd.f32 %v2363_v27, %v2348_v6  ;;  %v1750_v21 = vpop.eup %1749  ;;  %v1063_v36 = vsub.f32 0.0, %v807_v9  ;;  %1769 = vrcp.f32 %v1147_v25  ;;  %v1149_v32 = vadd.f32 1.0, %v1748_v59 }
 0x22e   : > { %v802_v37 = vadd.f32 %v2348_v6, %v2365_v34  ;;  %v1752_v50 = vpop.eup %1751  ;;  %v1061_v52 = vsub.f32 0.0, %v799_v26  ;;  %1771 = vrcp.f32 %v1145_v35  ;;  %v1152_v40 = vadd.f32 1.0, %v1750_v21 }
 0x22f   : > { %v1754_v3 = vpop.eup %1753  ;;  %v1064_v33 = vsub.f32 0.0, %v810_v38  ;;  %1773 = vrcp.f32 %v1148_v10  ;;  %v1113_v45 = vmul.f32 1.442695, %v1063_v36  ;;  %v1239_v2 = vmul.f32 %v1752_v50, %v2167_v11 }
 0x230   : > { %v1756_v27 = vpop.eup %1755  ;;  %1775 = vrcp.f32 %v1146_v15  ;;  %v1062_v46 = vsub.f32 0.0, %v802_v37  ;;  %v1109_v49 = vmul.f32 1.442695, %v1061_v52  ;;  %v1237_v8 = vmul.f32 %v1754_v3, %v2147_v4 }
 0x231   : > { %v1758_v43 = vpop.eup %1757  ;;  %1777 = vrcp.f32 %v1151_v22  ;;  %v1115_v56 = vmul.f32 1.442695, %v1064_v33  ;;  %v1240_v25 = vmul.f32 %v1756_v27, %v2170_v12 }
 0x232   : > { %v2371_v41 = vpop.f32.mrb[12].mxu1  ;;  %v1760_v47 = vpop.eup %1759  ;;  %1779 = vrcp.f32 %v1149_v32  ;;  %v1150_v61 = vadd.f32 1.0, %v1758_v43  ;;  %v1111_v1 = vmul.f32 1.442695, %v1062_v46 }
 0x233   : > { %v2374_v44 = vpop.f32.mrb[13].mxu1  ;;  %v823_v51 = vadd.f32 %v2371_v41, %v2348_v6  ;;  %v1762_v55 = vpop.eup %1761  ;;  %1781 = vrcp.f32 %v1152_v40  ;;  %v2412_v41 = vld [vmem:[%s2600_s6] ss:$0 sm:$0xff]  ;;  %v1238_v35 = vmul.f32 %v1760_v47, %v2150_v5 }
 0x234   : > { %v2376_v48 = vpop.f32.mrb[14].mxu1  ;;  %v815_v57 = vadd.f32 %v2348_v6, %v2374_v44  ;;  %v1764_v60 = vpop.eup %1763  ;;  %1783 = vpow2.f32 %v1113_v45  ;;  %v1155_v44 = vadd.f32 1.0, %v1762_v55 }
 0x235   : > { %v2378_v53 = vpop.f32.mrb[15].mxu1  ;;  %v826_v62 = vadd.f32 %v2376_v48, %v2348_v6  ;;  %v1766_v63 = vpop.eup %1765  ;;  %1785 = vpow2.f32 %v1109_v49  ;;  %v1067_v58 = vsub.f32 0.0, %v823_v51  ;;  %v1153_v26 = vadd.f32 1.0, %v1764_v60 }
 0x236   : > { %v1768_v9 = vpop.eup %1767  ;;  %1787 = vpow2.f32 %v1115_v56  ;;  %v1065_v48 = vsub.f32 0.0, %v815_v57  ;;  %v1156_v59 = vadd.f32 1.0, %v1766_v63  ;;  %v818_v36 = vadd.f32 %v2348_v6, %v2378_v53 }
 0x237   : > { %v1770_v38 = vpop.eup %1769  ;;  %1789 = vrcp.f32 %v1150_v61  ;;  %v1068_v10 = vsub.f32 0.0, %v826_v62  ;;  %v1154_v15 = vadd.f32 1.0, %v1768_v9  ;;  %v1121_v5 = vmul.f32 1.442695, %v1067_v58 }
 0x238   : > { %v1772_v4 = vpop.eup %1771  ;;  %1791 = vpow2.f32 %v1111_v1  ;;  %v1117_v33 = vmul.f32 1.442695, %v1065_v48  ;;  %v1066_v47 = vsub.f32 0.0, %v818_v36  ;;  %v1243_v61 = vmul.f32 %v1770_v38, %v2183_v17 }
 0x239   : > { %v1774_v50 = vpop.eup %1773  ;;  %1793 = vrcp.f32 %v1155_v44  ;;  %v1123_v53 = vmul.f32 1.442695, %v1068_v10  ;;  %v1241_v62 = vmul.f32 %v1772_v4, %v2173_v13 }
 0x23a   : > { %v2380_v0 = vpop.f32.mrb[16].mxu1  ;;  %v1776_v32 = vpop.eup %1775  ;;  %1795 = vrcp.f32 %v1153_v26  ;;  %v1244_v63 = vmul.f32 %v1774_v50, %v2186_v18  ;;  %v1119_v44 = vmul.f32 1.442695, %v1066_v47 }
 0x23b   : > { %v2382_v7 = vpop.f32.mrb[17].mxu1  ;;  %v1778_v43 = vpop.eup %1777  ;;  %1797 = vrcp.f32 %v1156_v59  ;;  %v839_v49 = vadd.f32 %v2380_v0, %v2348_v6 }
 0x23c   : > { %v2385_v16 = vpop.f32.mrb[18].mxu1  ;;  %v1780_v46 = vpop.eup %1779  ;;  %1799 = vrcp.f32 %v1154_v15  ;;  %v831_v56 = vadd.f32 %v2348_v6, %v2382_v7  ;;  %v1242_v7 = vmul.f32 %v1776_v32, %v2176_v14 }
 0x23d   : > { %v2389_v28 = vpop.f32.mrb[19].mxu1  ;;  %v1782_v55 = vpop.eup %1781  ;;  %1801 = vpow2.f32 %v1121_v5  ;;  %v842_v0 = vadd.f32 %v2385_v16, %v2348_v6  ;;  %v1071_v58 = vsub.f32 0.0, %v839_v49  ;;  %v1245_v36 = vmul.f32 %v1780_v46, %v2189_v19 }
 0x23e   : > { %v1784_v57 = vpop.eup %1783  ;;  %1803 = vpow2.f32 %v1117_v33  ;;  %v834_v17 = vadd.f32 %v2348_v6, %v2389_v28  ;;  %v1069_v48 = vsub.f32 0.0, %v831_v56 }
 0x23f   : > { %v1786_v1 = vpop.eup %1785  ;;  %1805 = vpow2.f32 %v1123_v53  ;;  %v1159_v26 = vadd.f32 1.0, %v1784_v57  ;;  %v1072_v4 = vsub.f32 0.0, %v842_v0 }
 0x240   : > { %v1788_v9 = vpop.eup %1787  ;;  %v1157_v14 = vadd.f32 1.0, %v1786_v1  ;;  %1807 = vpow2.f32 %v1119_v44  ;;  %v1070_v50 = vsub.f32 0.0, %v834_v17 }
 0x241   : > { %1809 = vrcp.f32 %v1159_v26  ;;  %v1131_v53 = vmul.f32 1.442695, %v1072_v4 }
 0x242   : > { %v2395_v39 = vpop.f32.mrb[20].mxu1  ;;  %1811 = vrcp.f32 %v1157_v14  ;;  %v1127_v47 = vmul.f32 1.442695, %v1070_v50 }
 0x243   : > { %v2397_v42 = vpop.f32.mrb[21].mxu1 }
 0x244   : > { %v2399_v34 = vpop.f32.mrb[22].mxu1  ;;  %v847_v33 = vadd.f32 %v2348_v6, %v2397_v42 }
 0x245   : > { %v2403_v54 = vpop.f32.mrb[23].mxu1 }
 0x246   : > { %v850_v49 = vadd.f32 %v2348_v6, %v2403_v54 }
 0x24a   : > { %v1633_v31 = vpop.f32.mrb[24].mxu1 }
 0x24b   : > { %v927_v11 = vadd.f32 %v1633_v31, %v2412_v41  ;;  %v918_v21 = vpop.f32.mrb[25].mxu1 }
 0x24c   : > { %v919_v12 = vadd.f32 %v2412_v41, %v918_v21  ;;  %v1634_v37 = vpop.f32.mrb[26].mxu1  ;;  %v1160_v21 = vadd.f32 1.0, %v1788_v9 }
 0x24d   : > { %v1271_v22 = vadd.f32 %v1239_v2, %v927_v11  ;;  %v930_v52 = vadd.f32 %v1634_v37, %v2412_v41  ;;  %v921_v3 = vpop.f32.mrb[27].mxu1  ;;  %v1247_v11 = vmul.f32 %v1778_v43, %v2199_v23  ;;  %v1129_v37 = vmul.f32 1.442695, %v1071_v58 }
 0x24e   : > { %v1269_v27 = vadd.f32 %v1237_v8, %v919_v12  ;;  %v922_v40 = vadd.f32 %v2412_v41, %v921_v3  ;;  %v1125_v23 = vmul.f32 1.442695, %v1069_v48  ;;  %v1248_v3 = vmul.f32 %v1782_v55, %v2202_v24  ;;  %v1857_v48 = vld [vmem:[%s2128_s15 + $0x60] sm:$0xff] }
 0x24f   : > { %1303 = vst [vmem:[%s2426_s8 + $0x10] sm:$0xff] %v1271_v22  ;;  %v1272_v45 = vadd.f32 %v1240_v25, %v930_v52  ;;  %v1790_v25 = vpop.eup %1789  ;;  %v855_v52 = vadd.f32 %v2395_v39, %v2348_v6  ;;  %1813 = vrcp.f32 %v1160_v21  ;;  %v858_v39 = vadd.f32 %v2399_v34, %v2348_v6 }
 0x250   : > { %1301 = vst [vmem:[%s2426_s8] sm:$0xff] %v1269_v27  ;;  %v1270_v51 = vadd.f32 %v1238_v35, %v922_v40  ;;  %v1792_v38 = vpop.eup %1791  ;;  %v1246_v40 = vmul.f32 %v1790_v25, %v2192_v20  ;;  %1815 = vpow2.f32 %v1129_v37 }
 0x251   : > { %1304 = vst [vmem:[%s2426_s8 + $0x18] sm:$0xff] %v1272_v45  ;;  %v2449_v28 = vpop.eup %1793  ;;  %v1158_v19 = vadd.f32 1.0, %v1792_v38  ;;  %1817 = vpow2.f32 %v1125_v23  ;;  %v1075_v55 = vsub.f32 0.0, %v855_v52  ;;  %v1076_v6 = vsub.f32 0.0, %v858_v39 }
 0x252   : > { %1302 = vst [vmem:[%s2426_s8 + $0x8] sm:$0xff] %v1270_v51  ;;  %v1637_v60 = vpop.f32.mrb[28].mxu1  ;;  %v2453_v12 = vpop.eup %1795  ;;  %1819 = vpow2.f32 %v1131_v53  ;;  %v1251_v17 = vmul.f32 %v2449_v28, %v2209_v29 }
 0x253   : > { %v943_v2 = vadd.f32 %v1637_v60, %v2412_v41  ;;  %v934_v8 = vpop.f32.mrb[29].mxu1  ;;  %v2456_v22 = vpop.eup %1797  ;;  %1821 = vpow2.f32 %v1127_v47 }
 0x254   : > { %v935_v13 = vadd.f32 %v2412_v41, %v934_v8  ;;  %v1638_v18 = vpop.f32.mrb[30].mxu1  ;;  %v2462_v32 = vpop.eup %1799  ;;  %1823 = vrcp.f32 %v1158_v19  ;;  %v1252_v29 = vmul.f32 %v2456_v22, %v2212_v30 }
 0x255   : > { %v1275_v31 = vadd.f32 %v1243_v61, %v943_v2  ;;  %v946_v16 = vadd.f32 %v1638_v18, %v2412_v41  ;;  %v937_v35 = vpop.f32.mrb[31].mxu1  ;;  %v1802_v43 = vpop.eup %1801  ;;  %v1073_v61 = vsub.f32 0.0, %v847_v33  ;;  %v1074_v2 = vsub.f32 0.0, %v850_v49 }
 0x256   : > { %v1273_v59 = vadd.f32 %v1241_v62, %v935_v13  ;;  %v938_v10 = vadd.f32 %v2412_v41, %v937_v35  ;;  %v1804_v46 = vpop.eup %1803  ;;  %v1163_v60 = vadd.f32 1.0, %v1802_v43  ;;  %v1139_v18 = vmul.f32 1.442695, %v1076_v6 }
 0x257   : > { %1307 = vst [vmem:[%s2426_s8 + $0x30] sm:$0xff] %v1275_v31  ;;  %v1276_v15 = vadd.f32 %v1244_v63, %v946_v16  ;;  %v1806_v20 = vpop.eup %1805  ;;  %v1161_v1 = vadd.f32 1.0, %v1804_v46  ;;  %v1133_v44 = vmul.f32 1.442695, %v1073_v61  ;;  %v1249_v31 = vmul.f32 %v1857_v48, %v2453_v12  ;;  %v1858_v12 = vld [vmem:[%s2128_s15 + $0x68] sm:$0xff] }
 0x258   : > { %1305 = vst [vmem:[%s2426_s8 + $0x20] sm:$0xff] %v1273_v59  ;;  %v1274_v5 = vadd.f32 %v1242_v7, %v938_v10  ;;  %v1164_v0 = vadd.f32 1.0, %v1806_v20  ;;  %v1137_v7 = vmul.f32 1.442695, %v1075_v55  ;;  %v1808_v9 = vpop.eup %1807  ;;  %1825 = vrcp.f32 %v1163_v60  ;;  %v1861_v55 = vld [vmem:[%s2128_s15 + $0x98] sm:$0xff] }
 0x259   : > { %1308 = vst [vmem:[%s2426_s8 + $0x38] sm:$0xff] %v1276_v15  ;;  %v1810_v13 = vpop.eup %1809  ;;  %1827 = vrcp.f32 %v1161_v1  ;;  %v1135_v35 = vmul.f32 1.442695, %v1074_v2  ;;  %v1162_v10 = vadd.f32 1.0, %v1808_v9  ;;  %v1250_v37 = vmul.f32 %v1858_v12, %v2462_v32 }
 0x25a   : > { %1306 = vst [vmem:[%s2426_s8 + $0x28] sm:$0xff] %v1274_v5  ;;  %v1641_v27 = vpop.f32.mrb[32].mxu1  ;;  %v1812_v16 = vpop.eup %1811  ;;  %1829 = vrcp.f32 %v1164_v0 }
 0x25b   : > { %v959_v45 = vadd.f32 %v1641_v27, %v2412_v41  ;;  %v950_v24 = vpop.f32.mrb[33].mxu1  ;;  %v1814_v59 = vpop.eup %1813  ;;  %1831 = vpow2.f32 %v1137_v7  ;;  %v1859_v27 = vld [vmem:[%s2128_s15 + $0x90] sm:$0xff] }
 0x25c   : > { %v951_v42 = vadd.f32 %v2412_v41, %v950_v24  ;;  %v1642_v51 = vpop.f32.mrb[34].mxu1  ;;  %v1816_v4 = vpop.eup %1815  ;;  %1833 = vpow2.f32 %v1133_v44  ;;  %v1860_v24 = vld [vmem:[%s2128_s15 + $0x80] sm:$0xff] }
 0x25d   : > { %v1279_v56 = vadd.f32 %v1247_v11, %v959_v45  ;;  %v962_v34 = vadd.f32 %v1642_v51, %v2412_v41  ;;  %v953_v57 = vpop.f32.mrb[35].mxu1  ;;  %v1818_v50 = vpop.eup %1817  ;;  %1835 = vpow2.f32 %v1139_v18  ;;  %v1167_v52 = vadd.f32 1.0, %v1816_v4  ;;  %v1866_v4 = vld [vmem:[%s2128_s15 + $0xa8] sm:$0xff] }
 0x25e   : > { %v1277_v62 = vadd.f32 %v1245_v36, %v951_v42  ;;  %v954_v63 = vadd.f32 %v2412_v41, %v953_v57  ;;  %1837 = vpow2.f32 %v1135_v35  ;;  %v1820_v22 = vpop.eup %1819  ;;  %v1165_v33 = vadd.f32 1.0, %v1818_v50 }
 0x25f   : > { %1311 = vst [vmem:[%s2426_s8 + $0x50] sm:$0xff] %v1279_v56  ;;  %v1280_v54 = vadd.f32 %v1248_v3, %v962_v34  ;;  %1839 = vrcp.f32 %v1162_v10  ;;  %v1822_v23 = vpop.eup %1821  ;;  %v1168_v39 = vadd.f32 1.0, %v1820_v22  ;;  %v1253_v46 = vmul.f32 %v1860_v24, %v1812_v16 }
 0x260   : > { %1309 = vst [vmem:[%s2426_s8 + $0x40] sm:$0xff] %v1277_v62  ;;  %v1278_v8 = vadd.f32 %v1246_v40, %v954_v63  ;;  %v1824_v19 = vpop.eup %1823  ;;  %v1255_v40 = vmul.f32 %v1859_v27, %v1810_v13  ;;  %v1166_v42 = vadd.f32 1.0, %v1822_v23  ;;  %v1256_v56 = vmul.f32 %v1861_v55, %v1814_v59  ;;  %v1862_v62 = vld [vmem:[%s2128_s15 + $0x88] sm:$0xff]  ;;  %v1863_v13 = vld [vmem:[%s2128_s15 + $0xb0] sm:$0xff]  ;;  %v1865_v59 = vld [vmem:[%s2128_s15 + $0xb8] sm:$0xff] }
 0x261   : > { %1312 = vst [vmem:[%s2426_s8 + $0x58] sm:$0xff] %v1280_v54  ;;  %1841 = vrcp.f32 %v1167_v52  ;;  %v1254_v63 = vmul.f32 %v1862_v62, %v1824_v19  ;;  %v1867_v52 = vld [vmem:[%s2128_s15 + $0xd0] sm:$0xff] }
 0x262   : > { %1310 = vst [vmem:[%s2426_s8 + $0x48] sm:$0xff] %v1278_v8  ;;  %v1645_v58 = vpop.f32.mrb[36].mxu1  ;;  %v1826_v53 = vpop.eup %1825  ;;  %1843 = vrcp.f32 %v1165_v33  ;;  %v1871_v62 = vld [vmem:[%s2128_s15 + $0xf0] sm:$0xff] }
 0x263   : > { %v975_v25 = vadd.f32 %v1645_v58, %v2412_v41  ;;  %v966_v26 = vpop.f32.mrb[37].mxu1  ;;  %v1828_v49 = vpop.eup %1827  ;;  %1845 = vrcp.f32 %v1168_v39  ;;  %v1259_v18 = vmul.f32 %v1863_v13, %v1826_v53  ;;  %v1869_v39 = vld [vmem:[%s2128_s15 + $0xd8] sm:$0xff] }
 0x264   : > { %v967_v38 = vadd.f32 %v2412_v41, %v966_v26  ;;  %v1646_v14 = vpop.f32.mrb[38].mxu1  ;;  %v1830_v57 = vpop.eup %1829  ;;  %1847 = vrcp.f32 %v1166_v42 }
 0x265   : > { %v1283_v11 = vadd.f32 %v1251_v17, %v975_v25  ;;  %v978_v28 = vadd.f32 %v1646_v14, %v2412_v41  ;;  %v969_v21 = vpop.f32.mrb[39].mxu1  ;;  %v1832_v1 = vpop.eup %1831  ;;  %v1260_v10 = vmul.f32 %v1865_v59, %v1830_v57 }
 0x266   : > { %v1281_v15 = vadd.f32 %v1249_v31, %v967_v38  ;;  %v970_v36 = vadd.f32 %v2412_v41, %v969_v21  ;;  %v1834_v54 = vpop.eup %1833  ;;  %v1171_v7 = vadd.f32 1.0, %v1832_v1  ;;  %v1864_v31 = vld [vmem:[%s2128_s15 + $0xa0] sm:$0xff] }
 0x267   : > { %1315 = vst [vmem:[%s2426_s8 + $0x70] sm:$0xff] %v1283_v11  ;;  %v1284_v30 = vadd.f32 %v1252_v29, %v978_v28  ;;  %v1836_v2 = vpop.eup %1835  ;;  %v1169_v58 = vadd.f32 1.0, %v1834_v54  ;;  %v1257_v16 = vmul.f32 %v1864_v31, %v1828_v49  ;;  %v1870_v49 = vld [vmem:[%s2128_s15 + $0xc8] sm:$0xff]  ;;  %v1872_v54 = vld [vmem:[%s2128_s15 + $0xe0] sm:$0xff] }
 0x268   : > { %1313 = vst [vmem:[%s2426_s8 + $0x60] sm:$0xff] %v1281_v15  ;;  %v1282_v5 = vadd.f32 %v1250_v37, %v970_v36  ;;  %v1838_v8 = vpop.eup %1837  ;;  %v1172_v26 = vadd.f32 1.0, %v1836_v2  ;;  %1849 = vrcp.f32 %v1171_v7 }
 0x269   : > { %1316 = vst [vmem:[%s2426_s8 + $0x78] sm:$0xff] %v1284_v30  ;;  %v1840_v44 = vpop.eup %1839  ;;  %v1170_v38 = vadd.f32 1.0, %v1838_v8  ;;  %1851 = vrcp.f32 %v1169_v58 }
 0x26a   : > { %1314 = vst [vmem:[%s2426_s8 + $0x68] sm:$0xff] %v1282_v5  ;;  %v1649_v3 = vpop.f32.mrb[40].mxu1  ;;  %v1258_v15 = vmul.f32 %v1866_v4, %v1840_v44  ;;  %1853 = vrcp.f32 %v1172_v26 }
 0x26b   : > { %v991_v32 = vadd.f32 %v1649_v3, %v2412_v41  ;;  %v982_v43 = vpop.f32.mrb[41].mxu1  ;;  %v1842_v12 = vpop.eup %1841  ;;  %1855 = vrcp.f32 %v1170_v38 }
 0x26c   : > { %v983_v45 = vadd.f32 %v2412_v41, %v982_v43  ;;  %v1650_v47 = vpop.f32.mrb[42].mxu1  ;;  %v1844_v50 = vpop.eup %1843  ;;  %v1263_v3 = vmul.f32 %v1867_v52, %v1842_v12 }
 0x26d   : > { %v1287_v51 = vadd.f32 %v1255_v40, %v991_v32  ;;  %v994_v20 = vadd.f32 %v1650_v47, %v2412_v41  ;;  %v985_v34 = vpop.f32.mrb[43].mxu1  ;;  %v1846_v30 = vpop.eup %1845  ;;  %v1868_v32 = vld [vmem:[%s2128_s15 + $0xc0] sm:$0xff] }
 0x26e   : > { %v1285_v60 = vadd.f32 %v1253_v46, %v983_v45  ;;  %v986_v61 = vadd.f32 %v2412_v41, %v985_v34  ;;  %v1848_v22 = vpop.eup %1847  ;;  %v1261_v27 = vmul.f32 %v1868_v32, %v1844_v50  ;;  %v1264_v45 = vmul.f32 %v1869_v39, %v1846_v30 }
 0x26f   : > { %1319 = vst [vmem:[%s2426_s8 + $0x90] sm:$0xff] %v1287_v51  ;;  %v1288_v6 = vadd.f32 %v1256_v56, %v994_v20  ;;  %v1262_v42 = vmul.f32 %v1870_v49, %v1848_v22 }
 0x270   : > { %1317 = vst [vmem:[%s2426_s8 + $0x80] sm:$0xff] %v1285_v60  ;;  %v1286_v0 = vadd.f32 %v1254_v63, %v986_v61 }
 0x271   : > { %1320 = vst [vmem:[%s2426_s8 + $0x98] sm:$0xff] %v1288_v6 }
 0x272   : > { %1318 = vst [vmem:[%s2426_s8 + $0x88] sm:$0xff] %v1286_v0  ;;  %v1653_v9 = vpop.f32.mrb[44].mxu1  ;;  %v1850_v20 = vpop.eup %1849 }
 0x273   : > { %v1007_v17 = vadd.f32 %v1653_v9, %v2412_v41  ;;  %v998_v25 = vpop.f32.mrb[45].mxu1  ;;  %v1852_v56 = vpop.eup %1851  ;;  %v1267_v63 = vmul.f32 %v1871_v62, %v1850_v20  ;;  %v1873_v9 = vld [vmem:[%s2128_s15 + $0xf8] sm:$0xff] }
 0x274   : > { %v999_v48 = vadd.f32 %v2412_v41, %v998_v25  ;;  %v1654_v35 = vpop.f32.mrb[46].mxu1  ;;  %v1854_v34 = vpop.eup %1853  ;;  %v1265_v0 = vmul.f32 %v1872_v54, %v1852_v56 }
 0x275   : > { %v1291_v14 = vadd.f32 %v1259_v18, %v1007_v17  ;;  %v1010_v29 = vadd.f32 %v1654_v35, %v2412_v41  ;;  %v1001_v11 = vpop.f32.mrb[47].mxu1  ;;  %v1856_v60 = vpop.eup %1855  ;;  %v1268_v44 = vmul.f32 %v1873_v9, %v1854_v34  ;;  %v1874_v18 = vld [vmem:[%s2128_s15 + $0xe8] sm:$0xff]  ;;  %s1976_s15 = smov [#allocation5]  }
 0x276   : > { %v1289_v28 = vadd.f32 %v1257_v16, %v999_v48  ;;  %v1002_v21 = vadd.f32 %v2412_v41, %v1001_v11  ;;  %v1266_v25 = vmul.f32 %v1874_v18, %v1856_v60  ;;  %s1909_s29 = sshll.u32 %s1976_s15, 4  ;;  %s1910_s29 = int_to_ptr.vmem [resolvable:$false] %s1909_s29 }
 0x277   : > { %1323 = vst [vmem:[%s2426_s8 + $0xb0] sm:$0xff] %v1291_v14  ;;  %v1292_v36 = vadd.f32 %v1260_v10, %v1010_v29  ;;  %s1911_s19 = scalar_lea.vmem %s1910_s29, 8192  ;;  %p1912_p8 = scmp.lt.s32.totalorder %s2548_s11, %s1910_s29 }
 0x278   : > { %1321 = vst [vmem:[%s2426_s8 + $0xa0] sm:$0xff] %v1289_v28  ;;  %v1290_v37 = vadd.f32 %v1258_v15, %v1002_v21  ;;  %p1913_p9 = scmp.lt.s32.totalorder %s1911_s19, %s1905_s23 }
 0x279   : > { %1324 = vst [vmem:[%s2426_s8 + $0xb8] sm:$0xff] %v1292_v36 }
 0x27a   : > { %1322 = vst [vmem:[%s2426_s8 + $0xa8] sm:$0xff] %v1290_v37  ;;  %v1657_v5 = vpop.f32.mrb[48].mxu1  ;;  %p1914_p13 = por %p1913_p9, %p1912_p8 }
 0x27b   : > { %v1023_v23 = vadd.f32 %v1657_v5, %v2412_v41  ;;  %v1014_v19 = vpop.f32.mrb[49].mxu1 }
 0x27c   : > { %v1015_v33 = vadd.f32 %v2412_v41, %v1014_v19  ;;  %v1658_v40 = vpop.f32.mrb[50].mxu1  ;;  %p1915_p1 = pnand %p1914_p13, %p1908_p12 }
 0x27d   : > { %v1295_v43 = vadd.f32 %v1263_v3, %v1023_v23  ;;  %v1026_v53 = vadd.f32 %v1658_v40, %v2412_v41  ;;  %v1017_v24 = vpop.f32.mrb[51].mxu1 }
 0x27e   : > { %v1293_v46 = vadd.f32 %v1261_v27, %v1015_v33  ;;  %v1018_v47 = vadd.f32 %v2412_v41, %v1017_v24 }
 0x27f   : > { %1327 = vst [vmem:[%s2426_s8 + $0xd0] sm:$0xff] %v1295_v43  ;;  %v1296_v51 = vadd.f32 %v1264_v45, %v1026_v53 }
 0x280   : > { %1325 = vst [vmem:[%s2426_s8 + $0xc0] sm:$0xff] %v1293_v46  ;;  %v1294_v55 = vadd.f32 %v1262_v42, %v1018_v47 }
 0x281   : > { %1328 = vst [vmem:[%s2426_s8 + $0xd8] sm:$0xff] %v1296_v51 }
 0x282   : > { %1326 = vst [vmem:[%s2426_s8 + $0xc8] sm:$0xff] %v1294_v55  ;;  %v1661_v57 = vpop.f32.mrb[52].mxu1 }
 0x283   : > { %v1039_v61 = vadd.f32 %v1661_v57, %v2412_v41  ;;  %v1030_v1 = vpop.f32.mrb[53].mxu1 }
 0x284   : > { %v1031_v6 = vadd.f32 %v2412_v41, %v1030_v1  ;;  %v1662_v2 = vpop.f32.mrb[54].mxu1 }
 0x285   : > { %v1299_v8 = vadd.f32 %v1267_v63, %v1039_v61  ;;  %v1042_v7 = vadd.f32 %v1662_v2, %v2412_v41  ;;  %v1033_v58 = vpop.f32.mrb[55].mxu1 }
 0x286   : > { %v1297_v17 = vadd.f32 %v1265_v0, %v1031_v6  ;;  %v1034_v13 = vadd.f32 %v2412_v41, %v1033_v58 }
 0x287   : > { %1331 = vst [vmem:[%s2426_s8 + $0xf0] sm:$0xff] %v1299_v8  ;;  %v1300_v26 = vadd.f32 %v1268_v44, %v1042_v7 }
 0x288   : > { %1329 = vst [vmem:[%s2426_s8 + $0xe0] sm:$0xff] %v1297_v17  ;;  %v1298_v48 = vadd.f32 %v1266_v25, %v1034_v13 }
 0x289   : > { %1332 = vst [vmem:[%s2426_s8 + $0xf8] sm:$0xff] %v1300_v26 }
 0x28a   : > { %1330 = vst [vmem:[%s2426_s8 + $0xe8] sm:$0xff] %v1298_v48 }
 0x28b   : > { %1918 = shalt.err (!%p1915_p1)
}
 0x28c   : > { %s1919_s21 = scalar_lea.hbm %s2546_s20, 4096  ;;  %s1923_s8 = scalar_lea.hbm %s2601_s7, 16384 }
 0x28d   : > { %p1920_p3 = scmp.ne.s32.totalorder %s2546_s20, %s1919_s21  ;;  %p1924_p0 = scmp.lt.u32.totalorder %s2546_s20, %s2601_s7 }
 0x28e   : > { %p1925_p2 = scmp.lt.u32.totalorder %s1923_s8, %s1919_s21  ;;  %p1927_p6 = scmp.lt.u32.totalorder %s1919_s21, %s2546_s20 }
 0x28f   : > { %p1921_p4 = pnand %p1920_p3, %p2608_p10 }
 0x290   : > { %p1926_p7 = por %p1925_p2, %p1924_p0 }
 0x291   : > { %p1922_p5 = pneg %p1921_p4 }
 0x292   : > { %p1928_p11 = por %p1927_p6, %p1926_p7 }
 0x294   : > { %p1929_p12 = pnand %p1928_p11, %p1922_p5 }
 0x296   : > { %1932 = shalt.err (!%p1929_p12)
}
 0x297   : > { %s1977_s28 = smov 128   ;;  %s1978_s23 = smov 8  }
 0x298   : > { %1669 = dma.vmem_to_hbm [thread:$0]  (%p2608_p10), %s2548_s11, 4096, %s2546_s20, %s1334_s22, %s1977_s28, %s1977_s28, %s1978_s23  }
 0x299 PF: > { %p1680_p8 = scmp.ge.s32.totalorder %s1971_s27, 2  ;;  %s1362_s15 = sand.u32 1, %s1959_s24  }
 0x29a   : > { %p2609_p9 = scmp.ne.s32.totalorder %s2606_s14, 0  ;;  %s1363_s29 = scalar_lea.sflag [#allocation4], %s1362_s15 }
 0x29c   : > { %p1676_p13 = pnand %p1680_p8, %p2609_p9 }
 0x29e   : > { %1954 = dma.done.wait (!%p1676_p13), %s1363_s29, 4096  }
 0x29f   : > { %1956 = vsyncadd (!%p1676_p13), %s1363_s29, 4294963200  ;;  %p20_p1 = scmp.ge.s32.totalorder %s2044_s30, 6   ;;  %s2610_s24 = smov %s1963_s25 }
 0x2a0   : > { %s2611_s25 = smov %s1967_s26  ;;  %s2612_s26 = smov %s2056_s10 }
 0x2a1   : > { %s2613_s27 = smov %s2044_s30  ;;  %22 = sbr.rel (!%p20_p1) target bundleno = 5 (0x5), region = 93 }
 0x2a8   :  { %1368 = vsyncpa [#allocation3], 1 }
 0x2a9   :  { %1370 = vsyncpa [#allocation3 + $0x1], 1 }
 0x2aa   :  { %1371 = vsyncpa [#allocation4], 1 }
 0x2ab   :  { %1373 = vsyncpa [#allocation4 + $0x1], 1 }

</bundles_post_ra>
